<compile_context>
chip_gen: v5e
topology: v5e:2x2
jax: 0.10.0
libtpu: 0.0.40
codegen_flags: <defaults>
</compile_context>

<pallas_src>
import functools

import jax
import jax.numpy as jnp
from jax.experimental import pallas as pl
from jax.experimental.pallas import tpu as pltpu


def _round_up(x, m):
    return (x + m - 1) // m * m


def _cdiv(a, b):
    return (a + b - 1) // b


def _f_chunks(f_total, chunk):
    """Static (start, size) chunks of the backbone feature dim F."""
    if f_total <= chunk:
        return ((0, f_total),)
    return tuple((f0, min(chunk, f_total - f0)) for f0 in range(0, f_total, chunk))


def _make_kernel(chunks):
    """out = (X @ W1) @ W2 + b2eff   (conv bias already folded into b2eff)."""
    if len(chunks) == 1:
        # Single F chunk: no accumulator scratch needed.
        def kernel(x_ref, w1_ref, w2_ref, b2_ref, out_ref):
            feat = jnp.dot(x_ref[...], w1_ref[...],
                           preferred_element_type=jnp.float32)
            out = jnp.dot(feat.astype(jnp.bfloat16), w2_ref[...],
                          preferred_element_type=jnp.float32)
            out_ref[...] = (out + b2_ref[...]).astype(out_ref.dtype)
        return kernel

    def kernel(x_ref, w1_ref, w2_ref, b2_ref, out_ref, acc_ref):
        x = x_ref[...]
        acc_ref[...] = jnp.zeros_like(acc_ref)
        # Static, lane-aligned slices of the resident weights; keeps the f32
        # intermediate at (TM, fc) and overlaps VPU cast work with MXU.
        for f0, fc in chunks:
            feat = jnp.dot(x, w1_ref[:, f0:f0 + fc],
                           preferred_element_type=jnp.float32)
            acc_ref[...] += jnp.dot(feat.astype(jnp.bfloat16),
                                    w2_ref[f0:f0 + fc, :],
                                    preferred_element_type=jnp.float32)
        out_ref[...] = (acc_ref[...] + b2_ref[...]).astype(out_ref.dtype)
    return kernel


def hybrid_embed(x_nchw, conv_w_pt, conv_b, proj_w_pt, proj_b, patch=4,
                 out_dtype=jnp.bfloat16, tm_max=1024, f_chunk=512):
    """x_nchw: (B, C, H, W). Returns (B, N, embed_dim), N = (H/p)*(W/p)."""
    B, C, H, W = x_nchw.shape
    assert H % patch == 0 and W % patch == 0, "H, W must be divisible by patch"
    Hp, Wp = H // patch, W // patch
    N = Hp * Wp
    M = B * N
    K1 = C * patch * patch
    F = conv_w_pt.shape[0]          # backbone feature_dim
    E = proj_w_pt.shape[0]          # embed_dim

    # --- tile sizing: >= 4 grid steps (v7x dual-TC + pipeline overlap),
    #     16-row granularity for bf16 sublane packing, capped by tm_max. ---
    TM = max(16, min(tm_max, _round_up(_cdiv(M, 4), 16)))
    TM = min(TM, _round_up(M, 16))
    grid_m = _cdiv(M, TM)

    # --- host-side operand prep (no pads, no trailing slices) ---
    # Cast to bf16 first so the single reorder pass moves half the bytes.
    xb = x_nchw.astype(jnp.bfloat16)
    xp = xb.reshape(B, C, Hp, patch, Wp, patch)
    xp = xp.transpose(0, 2, 4, 1, 3, 5).reshape(M, K1)     # (M, K1), (c,pr,pc) order
    # TODO(synk): fold this NCHW->patch reorder into the kernel (strided-tap
    # accumulation over a pl.ANY input with manual DMA) — see header note.

    w1 = conv_w_pt.reshape(F, K1).T.astype(jnp.bfloat16)   # (K1, F)
    w2 = proj_w_pt.T.astype(jnp.bfloat16)                  # (F, E)
    # Linear backbone => fold conv bias into proj bias:
    #   (feat + b1) @ W2 + b2 == feat @ W2 + (b1 @ W2 + b2)
    b2_eff = (conv_b.astype(jnp.float32) @ proj_w_pt.T.astype(jnp.float32)
              + proj_b.astype(jnp.float32)).reshape(1, E)
    # NOTE(synk): with no nonlinearity the whole op could fold to one matmul
    # (W1 @ W2, ~45x fewer FLOPs at ResNet-scale F); kept as two MXU passes so a
    # nonlinear backbone stage can later be inserted between them.

    chunks = _f_chunks(F, f_chunk)
    kernel = _make_kernel(chunks)

    in_specs = [
        # Streamed patch tiles (default double-buffered; partial last block is
        # masked — garbage rows only feed unwritten output rows).
        pl.BlockSpec((TM, K1), lambda i: (i, 0)),
        # Resident operands: constant index maps, single-buffered to halve
        # their VMEM footprint (matters at F=2048/E=768 under v7x's 64 MiB).
        pl.BlockSpec((K1, F), lambda i: (0, 0), pipeline_mode=pl.Buffered(1)),
        pl.BlockSpec((F, E), lambda i: (0, 0), pipeline_mode=pl.Buffered(1)),
        pl.BlockSpec((1, E), lambda i: (0, 0), pipeline_mode=pl.Buffered(1)),
    ]
    scratch_shapes = []
    if len(chunks) > 1:
        scratch_shapes = [pltpu.VMEM((TM, E), jnp.float32)]

    out_bytes = jnp.dtype(out_dtype).itemsize
    cost = pl.CostEstimate(
        flops=2 * M * (K1 * F + F * E),
        transcendentals=0,
        bytes_accessed=(M * K1 * 2 + K1 * F * 2 + F * E * 2 + E * 4
                        + M * E * out_bytes),
    )

    out = pl.pallas_call(
        kernel,
        out_shape=jax.ShapeDtypeStruct((M, E), out_dtype),
        grid=(grid_m,),
        in_specs=in_specs,
        out_specs=pl.BlockSpec((TM, E), lambda i: (i, 0)),
        scratch_shapes=scratch_shapes,
        compiler_params=pltpu.CompilerParams(
            dimension_semantics=("parallel",)),
        cost_estimate=cost,
    )(xp, w1, w2, b2_eff)

    return out.reshape(B, N, E)


def hybrid_embed_ref(x_nchw, conv_w_pt, conv_b, proj_w_pt, proj_b, patch=4):
    """Pure-JAX f32 reference matching PyTorch HybridEmbed.forward."""
    feat = jax.lax.conv_general_dilated(
        x_nchw, conv_w_pt, window_strides=(patch, patch), padding="VALID",
        dimension_numbers=("NCHW", "OIHW", "NCHW"))
    feat = feat + conv_b[None, :, None, None]
    B, F, Hp, Wp = feat.shape
    seq = feat.reshape(B, F, Hp * Wp).transpose(0, 2, 1)    # flatten(2).transpose(1,2)
    return seq @ proj_w_pt.T + proj_b                       # nn.Linear


if __name__ == "__main__":
    key = jax.random.PRNGKey(0)
    k_x, k_w1, k_b1, k_w2, k_b2 = jax.random.split(key, 5)

    # Test 1: batch=2, in_chans=4, img 16x16, patch-conv stride 4 -> 4x4 feature
    # map (num_patches=16), feature_dim=32, embed_dim=32 (single F chunk).
    B, C, H, W = 2, 4, 16, 16
    patch = 4
    feature_dim = 32
    embed_dim = 32

    x = jax.random.normal(k_x, (B, C, H, W), dtype=jnp.float32)
    conv_w = jax.random.normal(k_w1, (feature_dim, C, patch, patch), jnp.float32) * 0.05
    conv_b = jax.random.normal(k_b1, (feature_dim,), jnp.float32) * 0.05
    proj_w = jax.random.normal(k_w2, (embed_dim, feature_dim), jnp.float32) * 0.05
    proj_b = jax.random.normal(k_b2, (embed_dim,), jnp.float32) * 0.05

    embed = jax.jit(functools.partial(hybrid_embed, patch=patch))
    out = jax.block_until_ready(embed(x, conv_w, conv_b, proj_w, proj_b))
    ref = hybrid_embed_ref(x, conv_w, conv_b, proj_w, proj_b, patch=patch)
    assert out.shape == (B, (H // patch) * (W // patch), embed_dim)
    # bf16 operands/output with f32 accumulation -> loosened tolerance vs f32 ref.
    assert jnp.allclose(out.astype(jnp.float32), ref, atol=3e-2, rtol=3e-2), \
        "mismatch vs reference (test 1)"

    # Test 2: exercise the F-chunked accumulator path (F=256, chunk=128, E=128).
    k2 = jax.random.split(jax.random.PRNGKey(0), 5)
    C2, F2, E2 = 3, 256, 128
    x2 = jax.random.normal(k2[0], (B, C2, H, W), dtype=jnp.float32)
    conv_w2 = jax.random.normal(k2[1], (F2, C2, patch, patch), jnp.float32) * 0.05
    conv_b2 = jax.random.normal(k2[2], (F2,), jnp.float32) * 0.05
    proj_w2 = jax.random.normal(k2[3], (E2, F2), jnp.float32) * 0.05
    proj_b2 = jax.random.normal(k2[4], (E2,), jnp.float32) * 0.05

    embed2 = jax.jit(functools.partial(hybrid_embed, patch=patch, f_chunk=128))
    out2 = jax.block_until_ready(embed2(x2, conv_w2, conv_b2, proj_w2, proj_b2))
    ref2 = hybrid_embed_ref(x2, conv_w2, conv_b2, proj_w2, proj_b2, patch=patch)
    assert out2.shape == (B, (H // patch) * (W // patch), E2)
    assert jnp.allclose(out2.astype(jnp.float32), ref2, atol=5e-2, rtol=5e-2), \
        "mismatch vs reference (test 2, chunked F)"

    print("KERNEL_OK")
</pallas_src>

<mosaic_0001>
module attributes {stable_mosaic.version = 11 : i64} {
  func.func @kernel(%arg0: i32, %arg1: memref<16x64xbf16, #tpu.memory_space<vmem>>, %arg2: memref<64x32xbf16, #tpu.memory_space<vmem>>, %arg3: memref<32x32xbf16, #tpu.memory_space<vmem>>, %arg4: memref<1x32xf32, #tpu.memory_space<vmem>>, %arg5: memref<16x32xbf16, #tpu.memory_space<vmem>>) attributes {dimension_semantics = [#tpu.dimension_semantics<parallel>], iteration_bounds = array<i64: 2>, scalar_prefetch = 0 : i64, scratch_operands = 0 : i64, tpu.core_type = #tpu.core_type<tc>, window_params = [{transform_indices = @transform_0, window_bounds = array<i64: 16, 64>}, {pipeline_mode = #tpu.pipeline_mode<synchronous>, transform_indices = @transform_1, window_bounds = array<i64: 64, 32>}, {pipeline_mode = #tpu.pipeline_mode<synchronous>, transform_indices = @transform_2, window_bounds = array<i64: 32, 32>}, {pipeline_mode = #tpu.pipeline_mode<synchronous>, transform_indices = @transform_3, window_bounds = array<i64: 1, 32>}, {transform_indices = @transform_4, window_bounds = array<i64: 16, 32>}]} {
    %c0 = arith.constant 0 : index
    %c0_0 = arith.constant 0 : index
    %0 = vector.load %arg1[%c0, %c0_0] : memref<16x64xbf16, #tpu.memory_space<vmem>>, vector<16x64xbf16>
    %c0_1 = arith.constant 0 : index
    %c0_2 = arith.constant 0 : index
    %1 = vector.load %arg2[%c0_1, %c0_2] : memref<64x32xbf16, #tpu.memory_space<vmem>>, vector<64x32xbf16>
    %cst = arith.constant dense<0.000000e+00> : vector<16x32xf32>
    %2 = tpu.matmul %0, %1, %cst {dimension_numbers = #tpu.dot_dimension_numbers<[1], [0], [0], [1], [0, 0, 1, 1], [], []>} : vector<16x64xbf16>, vector<64x32xbf16>, vector<16x32xf32> -> vector<16x32xf32>
    %3 = arith.truncf %2 : vector<16x32xf32> to vector<16x32xbf16>
    %c0_3 = arith.constant 0 : index
    %c0_4 = arith.constant 0 : index
    %4 = vector.load %arg3[%c0_3, %c0_4] : memref<32x32xbf16, #tpu.memory_space<vmem>>, vector<32x32xbf16>
    %cst_5 = arith.constant dense<0.000000e+00> : vector<16x32xf32>
    %5 = tpu.matmul %3, %4, %cst_5 {dimension_numbers = #tpu.dot_dimension_numbers<[1], [0], [0], [1], [0, 0, 1, 1], [], []>} : vector<16x32xbf16>, vector<32x32xbf16>, vector<16x32xf32> -> vector<16x32xf32>
    %c0_6 = arith.constant 0 : index
    %c0_7 = arith.constant 0 : index
    %6 = vector.load %arg4[%c0_6, %c0_7] : memref<1x32xf32, #tpu.memory_space<vmem>>, vector<1x32xf32>
    %7 = vector.broadcast %6 : vector<1x32xf32> to vector<16x32xf32>
    %8 = arith.addf %5, %7 : vector<16x32xf32>
    %9 = arith.truncf %8 : vector<16x32xf32> to vector<16x32xbf16>
    %c0_8 = arith.constant 0 : index
    %c0_9 = arith.constant 0 : index
    %10 = vector.load %arg5[%c0_8, %c0_9] : memref<16x32xbf16, #tpu.memory_space<vmem>>, vector<16x32xbf16>
    tpu.vector_store %arg5[%c0_8, %c0_9], %9 {strides = array<i32>} : memref<16x32xbf16, #tpu.memory_space<vmem>>, vector<16x32xbf16>,
    return
  }
  func.func @transform_0(%arg0: i32) -> (i32, i32) {
    %c0_i32 = arith.constant 0 : i32
    %c0_i32_0 = arith.constant 0 : i32
    return %arg0, %c0_i32 : i32, i32
  }
  func.func @transform_1(%arg0: i32) -> (i32, i32) {
    %c0_i32 = arith.constant 0 : i32
    %c0_i32_0 = arith.constant 0 : i32
    %c0_i32_1 = arith.constant 0 : i32
    return %c0_i32, %c0_i32_0 : i32, i32
  }
  func.func @transform_2(%arg0: i32) -> (i32, i32) {
    %c0_i32 = arith.constant 0 : i32
    %c0_i32_0 = arith.constant 0 : i32
    %c0_i32_1 = arith.constant 0 : i32
    return %c0_i32, %c0_i32_0 : i32, i32
  }
  func.func @transform_3(%arg0: i32) -> (i32, i32) {
    %c0_i32 = arith.constant 0 : i32
    %c0_i32_0 = arith.constant 0 : i32
    %c0_i32_1 = arith.constant 0 : i32
    return %c0_i32, %c0_i32_0 : i32, i32
  }
  func.func @transform_4(%arg0: i32) -> (i32, i32) {
    %c0_i32 = arith.constant 0 : i32
    %c0_i32_0 = arith.constant 0 : i32
    return %arg0, %c0_i32 : i32, i32
  }
}

</mosaic_0001>

<bundles_post_ra>
// kernel: hybrid_embed.1
= control target key start
LH: loop header
LB: loop body
LE: loop exit
PB: predicated region body
PF: predicated region fallthrough
CT: control target
= control target key end

     0   :  { %9 = vsyncpa [#allocation3], 0  ;;  %s667_s0 = inlined_call_operand.vmem [shape: bf16[32,64], index: 0, kind: input, shape index: {}]   ;;  %s668_s1 = inlined_call_operand.vmem [shape: bf16[64,32], index: 1, kind: input, shape index: {}]   ;;  %s669_s2 = inlined_call_operand.vmem [shape: bf16[32,32], index: 2, kind: input, shape index: {}]   ;;  %s670_s3 = inlined_call_operand.vmem [shape: f32[1,32], index: 3, kind: input, shape index: {}]   ;;  %s671_s4 = inlined_call_operand.hbm [shape: bf16[32,32], index: 4, kind: output, shape index: {}]  }
   0x1   :  { %11 = vsyncpa [#allocation3 + $0x1], 0  ;;  %s562_s15 = smov 0   ;;  %s564_s16 = smov 0  }
   0x2   :  { %s566_s17 = smov 0   ;;  %s568_s18 = smov 0  }
   0x3 LB: > { %s583_s19 = sadd.s32 4294967295, %s533_s18   ;;  %s379_s20 = sadd.s32 4294967294, %s533_s18   ;;  %s533_s18 = sphi %s568_s18, %s677_s18   ;;  %s529_s17 = sphi %s566_s17, %s676_s17   ;;  %s525_s16 = sphi %s564_s16, %s675_s16   ;;  %s521_s15 = sphi %s562_s15, %s674_s15  }
   0x4   : > { %s587_s21 = sadd.s32 1, %s533_s18   ;;  %s113_s22 = sadd.s32 1, %s529_s17 }
   0x5   : > { %s110_s23 = ssub.s32 %s533_s18, %s587_s21  ;;  %p123_p0 = scmp.ne.s32.totalorder %s529_s17, %s525_s16 }
   0x6   : > { %p111_p1 = scmp.eq.s32.totalorder %s110_s23, 0  ;;  %p124_p2 = scmp.eq.s32.totalorder %s583_s19, 1 }
   0x7   : > { %p129_p3 = scmp.ne.s32.totalorder %s525_s16, %s521_s15  ;;  %p130_p4 = scmp.eq.s32.totalorder %s379_s20, 1 }
   0x8   : > { %s598_s24 = scalar_select %p111_p1, %s529_s17, %s113_s22  }
   0x9   : > { %p600_p5 = por %p124_p2, %p123_p0  ;;  %p604_p6 = por %p130_p4, %p129_p3 }
   0xa   : > { %p382_p7 = scmp.ge.s32.totalorder %s533_s18, 1  ;;  %p166_p8 = scmp.lt.s32.totalorder %s533_s18, 3 }
   0xc   : > { %p167_p9 = pnand %p382_p7, %p166_p8 }
   0xd   : > { %s384_s29 = sshll.u32 (!%p167_p9), %s583_s19, 1  ;;  %s189_s27 = sand.u32 (!%p167_p9), 1, %s525_s16  }
   0xe   : > { %170 = sbr.rel (%p167_p9) target bundleno = 313 (0x139), region = 36  ;;  %p193_p10 = scmp.lt.s32.totalorder (!%p167_p9), %s384_s29, 3 }
   0xf   : > { %s383_s30 = sshll.u32 (!%p167_p9), %s189_s27, 3  ;;  %s428_s5 = sshll.u32 (!%p167_p9), %s583_s19, 3 }
  0x10   : > { %s191_s9 = scalar_lea.vmem (!%p167_p9), [#allocation2], %s383_s30  ;;  %s302_s12 = scalar_lea.sflag (!%p167_p9), [#allocation3], %s189_s27 }
  0x11   : > { %s314_s10 = sshll.u32 (!%p167_p9), %s191_s9, 4  ;;  %s491_s22 = scalar_lea.hbm (!%p167_p9), %s671_s4, 16  ;;  %s315_s10 = int_to_ptr.vmem [resolvable:$true] %s314_s10 }
  0x13   : > { %v425_v0 = vld [vmem:[%s668_s1 + $0x18] sm:$0xff]  ;;  %v424_v1 = vld [vmem:[%s668_s1 + $0x10] sm:$0xff]  ;;  %s679_s29 = smov (!%p193_p10, %s384_s29), 3  ;;  %v423_v2 = vld [vmem:[%s668_s1 + $0x8] sm:$0xff]  ;;  %vm239_vm0 = vcmask 523264   ;;  %vm278_vm1 = vcmask 261120  }
  0x14   : > { %247 = vmatpush.bf16.msra.mxu0 %v425_v0  ;;  %s385_s8 = sshll.u32 %s679_s29, 2  ;;  %v422_v3 = vld [vmem:[%s668_s1] sm:$0xff]  ;;  %v427_v5 = vld [vmem:[%s669_s2 + $0x8] sm:$0xff]  ;;  %vm298_vm2 = vcmask 257024  }
  0x15   : > { %s196_s13 = scalar_lea.vmem %s667_s0, %s385_s8  ;;  %288 = vmatpush.bf16.msra.mxu1 %v427_v5  ;;  %v426_v6 = vld [vmem:[%s669_s2] sm:$0xff]  ;;  %s313_s8 = scalar_lea.hbm %s671_s4, %s428_s5 }
  0x16   : > { %v421_v4 = vld [vmem:[%s196_s13] sm:$0xff]  ;;  %s316_s11 = sshll.u32 %s313_s8, 4  ;;  %s317_s11 = int_to_ptr.hbm [resolvable:$true] %s316_s11 }
  0x17   : > { %v470_v10 = vld [vmem:[%s670_s3] ss:$0 sm:$0xff]  ;;  %s485_s13 = sshra.s32 %s317_s11, 4  ;;  %s486_s13 = int_to_ptr.hbm [resolvable:$true] %s485_s13 }
  0x18   : > { %248 = vmatpush.bf16.msra.mxu0 %v424_v1  ;;  %s487_s19 = scalar_lea.hbm %s486_s13, 8  ;;  %p492_p0 = scmp.lt.s32.totalorder %s486_s13, %s671_s4 }
  0x19   : > { %289 = vmatpush.bf16.msra.mxu1 %v426_v6  ;;  %p488_p11 = scmp.ne.s32.totalorder %s486_s13, %s487_s19  ;;  %p493_p1 = scmp.lt.s32.totalorder %s491_s22, %s487_s19 }
  0x1b   : > { %p489_p12 = pnand %p488_p11, %p600_p5  ;;  %p494_p2 = por %p493_p1, %p492_p0 }
  0x1c   : > { %249 = vmatpush.bf16.msra.mxu0 %v423_v2 }
  0x1d   : > { %p490_p13 = pneg %p489_p12 }
  0x1f   : > { %p495_p3 = pnand %p494_p2, %p490_p13 }
  0x20   : > { %250 = vmatpush.bf16.msra.mxu0 %v422_v3 }
  0x23   : > { %406 = vmatmul.msk.bf16.vlgmr.msra.gmra.mxu0 %vm239_vm0, %v421_v4 }
  0xa0   : > { %v252_v7 = vpop.f32.mrf.mxu0 }
  0xa8   : > { %v254_v8 = vpop.f32.mrf.mxu0 }
  0xa9   : > { %v257_v9 = vpack.c.bf16 %v254_v8, %v252_v7 }
  0xab   : > { %415 = vmatmul.msk.bf16.vlgmr.msra.gmra.mxu1 %vm278_vm1, %v257_v9 }
 0x128   : > { %v291_v11 = vpop.f32.mrf.mxu1 }
 0x129   : > { %v292_v12 = vadd.f32 %v470_v10, %v291_v11 }
 0x12b   : > { %v296_v13 = vpack.c.bf16 %v292_v12, %v292_v12 }
 0x12d   : > { %299 = vst.msk [vmem:[%s191_s9] sm:$0xf] %vm298_vm2, %v296_v13 }
 0x130   : > { %v293_v14 = vpop.f32.mrf.mxu1 }
 0x131   : > { %v294_v15 = vadd.f32 %v470_v10, %v293_v14 }
 0x133   : > { %v297_v16 = vpack.c.bf16 %v294_v15, %v294_v15 }
 0x135   : > { %300 = vst.msk [vmem:[%s191_s9 + $0x4] sm:$0xf] %vm298_vm2, %v297_v16 }
 0x136   : > { %498 = shalt.err (!%p495_p3)
}
 0x137   : > { %s535_s27 = smov 64   ;;  %s536_s29 = smov 4  }
 0x138   : > { %429 = dma.vmem_to_hbm [thread:$0]  (%p600_p5), %s315_s10, 128, %s317_s11, %s302_s12, %s535_s27, %s535_s27, %s536_s29  }
 0x139 PF: > { %p435_p4 = scmp.ge.s32.totalorder %s533_s18, 2  ;;  %s331_s30 = sand.u32 1, %s521_s15  }
 0x13a   : > { %s332_s5 = scalar_lea.sflag [#allocation3], %s331_s30 }
 0x13b   : > { %p432_p7 = pnand %p435_p4, %p604_p6 }
 0x13d   : > { %p433_p8 = pneg %p432_p7 }
 0x13f   : > { %516 = dma.done.wait (%p433_p8), %s332_s5, 128  }
 0x140   : > { %518 = vsyncadd (%p433_p8), %s332_s5, 4294967168  ;;  %p14_p9 = scmp.ge.s32.totalorder %s587_s21, 4   ;;  %s674_s15 = smov %s525_s16 }
 0x141   : > { %s675_s16 = smov %s529_s17  ;;  %s676_s17 = smov %s598_s24 }
 0x142   : > { %s677_s18 = smov %s587_s21  ;;  %16 = sbr.rel (!%p14_p9) target bundleno = 3 (0x3), region = 71 }
 0x147   :  { %338 = vsyncpa [#allocation3], 1 }
 0x148   :  { %340 = vsyncpa [#allocation3 + $0x1], 1 }

</bundles_post_ra>
